<compile_context>
chip_gen: v5e
topology: v5e:2x2
jax: 0.10.0
libtpu: 0.0.40
codegen_flags: <defaults>
</compile_context>

<pallas_src>
import functools
from collections import namedtuple

import jax
import jax.numpy as jnp
from jax.experimental import pallas as pl
from jax.experimental.pallas import tpu as pltpu

Genotype = namedtuple("Genotype", "normal normal_concat reduce reduce_concat")

GENOTYPE = Genotype(
    normal=[("max_pool_3x3", 0), ("skip_connect", 1),
            ("avg_pool_3x3", 1), ("skip_connect", 0)],
    normal_concat=[2, 3],
    reduce=[("max_pool_3x3", 0), ("skip_connect", 1),
            ("avg_pool_3x3", 1), ("skip_connect", 0)],
    reduce_concat=[2, 3],
)

BN_EPS = 1e-5  # PyTorch BatchNorm2d default


def _round_up(x, m):
    return (x + m - 1) // m * m


# ----------------------------------------------------------------------------
# Fused cell kernel: preprocess0/1 + (maxpool+skip) + (avgpool+skip) + concat
# ----------------------------------------------------------------------------
def _cell_kernel(x_ref, w_ref, b_ref, addm_ref, mulm_ref, invc_ref, o_ref,
                 *, Cpad, W, LANES):
    """One grid step = n_tile batch samples folded onto the lane axis.

      x_ref:    (C_pp + C_p, LANES)   raw inputs (ReLU applied here)
      w_ref:    (2*Cpad, C_pp + C_p)  block-diag [w0*bn0_scale ; w1*bn1_scale]
      b_ref:    (2*Cpad, 1)           folded BN biases
      addm_ref: (4, LANES)            {0, -inf} additive masks (l, r, u, d taps)
      mulm_ref: (4, LANES)            {0, 1}    multiplicative masks
      invc_ref: (1, LANES)            1 / (#valid taps)  (count_include_pad=False)
      o_ref:    (2*Cpad, LANES)       rows [0:Cpad]=node2, [Cpad:2Cpad]=node3
    """
    # ReLU -> single block-diagonal 1x1 conv (BN scale pre-folded) -> + bias.
    # One MXU push produces both preprocessed states stacked on sublanes.
    # TODO(synk): at realistic channel counts cast dot operands to bf16 on
    # v6e/v7x (keep preferred_element_type=f32); at this size the MXU is idle.
    both = jnp.dot(w_ref[...], jnp.maximum(x_ref[...], 0.0),
                   preferred_element_type=jnp.float32) + b_ref[...]
    s0p = both[:Cpad, :]     # preprocess0 output -> gets max-pooled
    s1p = both[Cpad:, :]     # preprocess1 output -> gets avg-pooled

    addm = addm_ref[...]
    mulm = mulm_ref[...]
    add_l, add_r, add_u, add_d = addm[0:1], addm[1:2], addm[2:3], addm[3:4]
    mul_l, mul_r, mul_u, mul_d = mulm[0:1], mulm[1:2], mulm[2:3], mulm[3:4]

    # --- separable 3x3 pooling: horizontal (+-1 lane) then vertical (+-W). ---
    # Shared horizontal XLU rolls over the full slab; cross-row / cross-sample
    # wrap contributions are killed by the per-lane masks.
    lft = pltpu.roll(both, shift=1, axis=1)           # value from p-1
    rgt = pltpu.roll(both, shift=LANES - 1, axis=1)   # value from p+1

    # Horizontal pass: max only on the s0p half, sum only on the s1p half.
    # Max accumulator starts from the always-valid center tap.
    hmax = jnp.maximum(s0p, jnp.maximum(lft[:Cpad] + add_l, rgt[:Cpad] + add_r))
    hsum = s1p + lft[Cpad:] * mul_l + rgt[Cpad:] * mul_r

    # Vertical pass on the half-sized intermediates.
    mx = jnp.maximum(
        hmax,
        jnp.maximum(pltpu.roll(hmax, shift=W, axis=1) + add_u,
                    pltpu.roll(hmax, shift=LANES - W, axis=1) + add_d))
    sm = (hsum
          + pltpu.roll(hsum, shift=W, axis=1) * mul_u
          + pltpu.roll(hsum, shift=LANES - W, axis=1) * mul_d)

    # node2 = max_pool(s0p) + s1p ; node3 = avg_pool(s1p) + s0p, written
    # straight into the channel-concatenated lane-dense output block.
    o_ref[0:Cpad, :] = mx + s1p
    o_ref[Cpad:, :] = sm * invc_ref[...] + s0p


# ----------------------------------------------------------------------------
# Cell parameters (deterministic, in-script) and forward pass
# ----------------------------------------------------------------------------
def init_cell_params(key, C_prev_prev, C_prev, C):
    ks = jax.random.split(key, 10)

    def make_pre(kw, kg, kb, km, kv, cin, cout):
        w = jax.random.normal(kw, (cout, cin, 1, 1), jnp.float32) * 0.1
        # Eval-mode BatchNorm folded to scale/bias (non-trivial stats so the
        # fold is actually exercised).
        gamma = 1.0 + 0.1 * jax.random.normal(kg, (cout,), jnp.float32)
        beta = 0.1 * jax.random.normal(kb, (cout,), jnp.float32)
        mean = 0.1 * jax.random.normal(km, (cout,), jnp.float32)
        var = jnp.abs(1.0 + 0.1 * jax.random.normal(kv, (cout,), jnp.float32))
        scale = gamma / jnp.sqrt(var + BN_EPS)
        bias = beta - mean * scale
        return {"w": w, "scale": scale, "bias": bias}

    return {"pre0": make_pre(*ks[0:5], C_prev_prev, C),
            "pre1": make_pre(*ks[5:10], C_prev, C)}


def _pick_batch_tile(N, HW, target_lanes=512, min_steps=2):
    """Samples per grid step: biggest divisor of N with <= target lanes, but
    keep >= min_steps grid steps (v7x has 2 TensorCores) when N allows."""
    n_tile = 1
    for t in range(1, N + 1):
        if N % t == 0 and t * HW <= target_lanes:
            n_tile = t
    while n_tile > 1 and N // n_tile < min(min_steps, N):
        n_tile = max(t for t in range(1, n_tile) if N % t == 0)
    return n_tile


def cell_forward(params, s0, s1, drop_prob=0.0):
    # TODO(synk): drop_path (training-time stochastic depth) not implemented;
    # this forward matches PyTorch eval mode / drop_prob == 0.
    del drop_prob
    N, C_pp, H, W = s0.shape
    _, C_p, Hs, Ws = s1.shape
    assert (Hs, Ws) == (H, W)
    C = params["pre0"]["w"].shape[0]
    HW = H * W
    Cpad = _round_up(C, 8)            # f32 sublane multiple -> free half-slab split

    n_tile = _pick_batch_tile(N, HW)
    LANES = n_tile * HW
    steps = N // n_tile

    # --- layout plumbing (wrapper-side, paid once): channels-major with the
    # batch folded onto the lane axis so every grid step gets a wide slab.
    x0 = jnp.transpose(s0.reshape(N, C_pp, HW), (1, 0, 2)).reshape(C_pp, N * HW)
    x1 = jnp.transpose(s1.reshape(N, C_p, HW), (1, 0, 2)).reshape(C_p, N * HW)
    x = jnp.concatenate([x0, x1], axis=0)                 # (C_pp + C_p, N*HW)

    # --- fold eval-mode BN scale into the 1x1 weights; build ONE block-diag
    # weight and ONE bias so the kernel does a single MXU push per step.
    w0 = params["pre0"]["w"].reshape(C, C_pp) * params["pre0"]["scale"][:, None]
    w1 = params["pre1"]["w"].reshape(C, C_p) * params["pre1"]["scale"][:, None]
    w_blk = jnp.zeros((2 * Cpad, C_pp + C_p), jnp.float32)
    w_blk = w_blk.at[:C, :C_pp].set(w0)
    w_blk = w_blk.at[Cpad:Cpad + C, C_pp:].set(w1)
    b_blk = jnp.zeros((2 * Cpad, 1), jnp.float32)
    b_blk = b_blk.at[:C, 0].set(params["pre0"]["bias"])
    b_blk = b_blk.at[Cpad:Cpad + C, 0].set(params["pre1"]["bias"])

    # --- data-independent pooling constants, hoisted out of the kernel.
    lane = jnp.arange(LANES, dtype=jnp.int32)
    pin = lane % HW
    row = pin // W
    col = pin - row * W
    v_l = col >= 1          # neighbour at col-1 exists
    v_r = col <= W - 2      # col+1
    v_u = row >= 1          # row-1
    v_d = row <= H - 2      # row+1
    neg = jnp.float32(-jnp.inf)
    addm = jnp.stack([jnp.where(v_l, 0.0, neg), jnp.where(v_r, 0.0, neg),
                      jnp.where(v_u, 0.0, neg), jnp.where(v_d, 0.0, neg)]
                     ).astype(jnp.float32)                       # (4, LANES)
    mulm = jnp.stack([v_l, v_r, v_u, v_d]).astype(jnp.float32)   # (4, LANES)
    ncol = 1 + v_l.astype(jnp.int32) + v_r.astype(jnp.int32)
    nrow = 1 + v_u.astype(jnp.int32) + v_d.astype(jnp.int32)
    invc = (1.0 / (ncol * nrow).astype(jnp.float32)).reshape(1, LANES)

    kernel = functools.partial(_cell_kernel, Cpad=Cpad, W=W, LANES=LANES)
    out = pl.pallas_call(
        kernel,
        out_shape=jax.ShapeDtypeStruct((2 * Cpad, N * HW), jnp.float32),
        grid=(steps,),
        in_specs=[
            pl.BlockSpec((C_pp + C_p, LANES), lambda t: (0, t)),
            pl.BlockSpec((2 * Cpad, C_pp + C_p), lambda t: (0, 0)),
            pl.BlockSpec((2 * Cpad, 1), lambda t: (0, 0)),
            pl.BlockSpec((4, LANES), lambda t: (0, 0)),
            pl.BlockSpec((4, LANES), lambda t: (0, 0)),
            pl.BlockSpec((1, LANES), lambda t: (0, 0)),
        ],
        out_specs=pl.BlockSpec((2 * Cpad, LANES), lambda t: (0, t)),
        compiler_params=pltpu.CompilerParams(
            dimension_semantics=("parallel",)),
        # TODO(synk): at realistic sizes tile along channels/batch only (never
        # the H*W lane axis: the roll+mask pooling has no halo) and size blocks
        # for v7x's 64 MiB VMEM via vmem_limit_bytes.
    )(x, w_blk, b_blk, addm, mulm, invc)

    # Undo the layout plumbing: (2*Cpad, N*HW) -> (N, 2C, H, W), drop pad rows.
    out = jnp.transpose(out.reshape(2 * Cpad, N, HW), (1, 0, 2))
    node2 = out[:, :C]
    node3 = out[:, Cpad:Cpad + C]
    return jnp.concatenate([node2, node3], axis=1).reshape(N, 2 * C, H, W)


# ----------------------------------------------------------------------------
# Pure-JAX reference (mirrors the PyTorch module semantics) for verification
# ----------------------------------------------------------------------------
def _reference_forward(params, s0, s1):
    def relu_conv_bn(x, p):
        x = jnp.maximum(x, 0.0)
        w = p["w"][:, :, 0, 0]
        y = jnp.einsum("nchw,oc->nohw", x, w)
        return y * p["scale"][None, :, None, None] + p["bias"][None, :, None, None]

    def maxpool(x):
        N, C, H, W = x.shape
        xp = jnp.pad(x, ((0, 0), (0, 0), (1, 1), (1, 1)), constant_values=-jnp.inf)
        return jnp.max(jnp.stack([xp[:, :, di:di + H, dj:dj + W]
                                  for di in range(3) for dj in range(3)]), axis=0)

    def avgpool(x):
        N, C, H, W = x.shape
        xp = jnp.pad(x, ((0, 0), (0, 0), (1, 1), (1, 1)))
        tot = sum(xp[:, :, di:di + H, dj:dj + W] for di in range(3) for dj in range(3))
        ones = jnp.pad(jnp.ones((1, 1, H, W)), ((0, 0), (0, 0), (1, 1), (1, 1)))
        cnt = sum(ones[:, :, di:di + H, dj:dj + W] for di in range(3) for dj in range(3))
        return tot / cnt  # count_include_pad=False (DARTS operations.py)

    s0p = relu_conv_bn(s0, params["pre0"])
    s1p = relu_conv_bn(s1, params["pre1"])
    n2 = maxpool(s0p) + s1p
    n3 = avgpool(s1p) + s0p
    return jnp.concatenate([n2, n3], axis=1)


if __name__ == "__main__":
    key = jax.random.PRNGKey(0)
    kp, k0, k1 = jax.random.split(key, 3)

    # H*W = 128 (lane-dense); N=4 exercises batch-folding (2 samples / step,
    # grid=(2,) "parallel" so both v7x TensorCores get work); C=4 exercises
    # channel padding to the sublane multiple (Cpad=8).
    N, C_prev_prev, C_prev, C, H, W = 4, 8, 8, 4, 8, 16
    params = init_cell_params(kp, C_prev_prev, C_prev, C)
    s0 = jax.random.normal(k0, (N, C_prev_prev, H, W), jnp.float32)
    s1 = jax.random.normal(k1, (N, C_prev, H, W), jnp.float32)

    fwd = jax.jit(functools.partial(cell_forward, drop_prob=0.0))
    out = jax.block_until_ready(fwd(params, s0, s1))

    ref = _reference_forward(params, s0, s1)
    assert out.shape == (N, len(GENOTYPE.normal_concat) * C, H, W), out.shape
    assert jnp.allclose(out, ref, atol=2e-3, rtol=2e-3), float(jnp.max(jnp.abs(out - ref)))
    print("KERNEL_OK")
</pallas_src>

<mosaic_0001>
module attributes {stable_mosaic.version = 11 : i64} {
  func.func @_cell_kernel(%arg0: i32, %arg1: memref<16x256xf32, #tpu.memory_space<vmem>>, %arg2: memref<16x16xf32, #tpu.memory_space<vmem>>, %arg3: memref<16x1xf32, #tpu.memory_space<vmem>>, %arg4: memref<4x256xf32, #tpu.memory_space<vmem>>, %arg5: memref<4x256xf32, #tpu.memory_space<vmem>>, %arg6: memref<1x256xf32, #tpu.memory_space<vmem>>, %arg7: memref<16x256xf32, #tpu.memory_space<vmem>>) attributes {dimension_semantics = [#tpu.dimension_semantics<parallel>], iteration_bounds = array<i64: 2>, scalar_prefetch = 0 : i64, scratch_operands = 0 : i64, tpu.core_type = #tpu.core_type<tc>, window_params = [{transform_indices = @transform_0, window_bounds = array<i64: 16, 256>}, {pipeline_mode = #tpu.pipeline_mode<synchronous>, transform_indices = @transform_1, window_bounds = array<i64: 16, 16>}, {pipeline_mode = #tpu.pipeline_mode<synchronous>, transform_indices = @transform_2, window_bounds = array<i64: 16, 1>}, {pipeline_mode = #tpu.pipeline_mode<synchronous>, transform_indices = @transform_3, window_bounds = array<i64: 4, 256>}, {pipeline_mode = #tpu.pipeline_mode<synchronous>, transform_indices = @transform_4, window_bounds = array<i64: 4, 256>}, {pipeline_mode = #tpu.pipeline_mode<synchronous>, transform_indices = @transform_5, window_bounds = array<i64: 1, 256>}, {transform_indices = @transform_6, window_bounds = array<i64: 16, 256>}]} {
    %c0 = arith.constant 0 : index
    %c0_0 = arith.constant 0 : index
    %0 = vector.load %arg2[%c0, %c0_0] : memref<16x16xf32, #tpu.memory_space<vmem>>, vector<16x16xf32>
    %c0_1 = arith.constant 0 : index
    %c0_2 = arith.constant 0 : index
    %1 = vector.load %arg1[%c0_1, %c0_2] : memref<16x256xf32, #tpu.memory_space<vmem>>, vector<16x256xf32>
    %cst = arith.constant 0.000000e+00 : f32
    %2 = vector.broadcast %cst : f32 to vector<16x256xf32>
    %3 = arith.maximumf %1, %2 : vector<16x256xf32>
    %cst_3 = arith.constant dense<0.000000e+00> : vector<16x256xf32>
    %4 = tpu.matmul %0, %3, %cst_3 {dimension_numbers = #tpu.dot_dimension_numbers<[1], [0], [0], [1], [0, 0, 1, 1], [], []>} : vector<16x16xf32>, vector<16x256xf32>, vector<16x256xf32> -> vector<16x256xf32>
    %c0_4 = arith.constant 0 : index
    %c0_5 = arith.constant 0 : index
    %5 = vector.load %arg3[%c0_4, %c0_5] : memref<16x1xf32, #tpu.memory_space<vmem>>, vector<16x1xf32>
    %6 = vector.broadcast %5 : vector<16x1xf32> to vector<16x256xf32>
    %7 = arith.addf %4, %6 : vector<16x256xf32>
    %8 = vector.extract_strided_slice %7 {offsets = [0, 0], sizes = [8, 256], strides = [1, 1]} : vector<16x256xf32> to vector<8x256xf32>
    %9 = vector.extract_strided_slice %7 {offsets = [8, 0], sizes = [8, 256], strides = [1, 1]} : vector<16x256xf32> to vector<8x256xf32>
    %c0_6 = arith.constant 0 : index
    %c0_7 = arith.constant 0 : index
    %10 = vector.load %arg4[%c0_6, %c0_7] : memref<4x256xf32, #tpu.memory_space<vmem>>, vector<4x256xf32>
    %c0_8 = arith.constant 0 : index
    %c0_9 = arith.constant 0 : index
    %11 = vector.load %arg5[%c0_8, %c0_9] : memref<4x256xf32, #tpu.memory_space<vmem>>, vector<4x256xf32>
    %12 = vector.extract_strided_slice %10 {offsets = [0, 0], sizes = [1, 256], strides = [1, 1]} : vector<4x256xf32> to vector<1x256xf32>
    %13 = vector.extract_strided_slice %10 {offsets = [1, 0], sizes = [1, 256], strides = [1, 1]} : vector<4x256xf32> to vector<1x256xf32>
    %14 = vector.extract_strided_slice %10 {offsets = [2, 0], sizes = [1, 256], strides = [1, 1]} : vector<4x256xf32> to vector<1x256xf32>
    %15 = vector.extract_strided_slice %10 {offsets = [3, 0], sizes = [1, 256], strides = [1, 1]} : vector<4x256xf32> to vector<1x256xf32>
    %16 = vector.extract_strided_slice %11 {offsets = [0, 0], sizes = [1, 256], strides = [1, 1]} : vector<4x256xf32> to vector<1x256xf32>
    %17 = vector.extract_strided_slice %11 {offsets = [1, 0], sizes = [1, 256], strides = [1, 1]} : vector<4x256xf32> to vector<1x256xf32>
    %18 = vector.extract_strided_slice %11 {offsets = [2, 0], sizes = [1, 256], strides = [1, 1]} : vector<4x256xf32> to vector<1x256xf32>
    %19 = vector.extract_strided_slice %11 {offsets = [3, 0], sizes = [1, 256], strides = [1, 1]} : vector<4x256xf32> to vector<1x256xf32>
    %c1_i32 = arith.constant 1 : i32
    %20 = tpu.dynamic_rotate %7 by %c1_i32 dim 1 : vector<16x256xf32>, i32 -> vector<16x256xf32>
    %c255_i32 = arith.constant 255 : i32
    %21 = tpu.dynamic_rotate %7 by %c255_i32 dim 1 : vector<16x256xf32>, i32 -> vector<16x256xf32>
    %22 = vector.extract_strided_slice %20 {offsets = [0, 0], sizes = [8, 256], strides = [1, 1]} : vector<16x256xf32> to vector<8x256xf32>
    %23 = vector.broadcast %12 : vector<1x256xf32> to vector<8x256xf32>
    %24 = arith.addf %22, %23 : vector<8x256xf32>
    %25 = vector.extract_strided_slice %21 {offsets = [0, 0], sizes = [8, 256], strides = [1, 1]} : vector<16x256xf32> to vector<8x256xf32>
    %26 = vector.broadcast %13 : vector<1x256xf32> to vector<8x256xf32>
    %27 = arith.addf %25, %26 : vector<8x256xf32>
    %28 = arith.maximumf %24, %27 : vector<8x256xf32>
    %29 = arith.maximumf %8, %28 : vector<8x256xf32>
    %30 = vector.extract_strided_slice %20 {offsets = [8, 0], sizes = [8, 256], strides = [1, 1]} : vector<16x256xf32> to vector<8x256xf32>
    %31 = vector.broadcast %16 : vector<1x256xf32> to vector<8x256xf32>
    %32 = arith.mulf %30, %31 : vector<8x256xf32>
    %33 = arith.addf %9, %32 : vector<8x256xf32>
    %34 = vector.extract_strided_slice %21 {offsets = [8, 0], sizes = [8, 256], strides = [1, 1]} : vector<16x256xf32> to vector<8x256xf32>
    %35 = vector.broadcast %17 : vector<1x256xf32> to vector<8x256xf32>
    %36 = arith.mulf %34, %35 : vector<8x256xf32>
    %37 = arith.addf %33, %36 : vector<8x256xf32>
    %c16_i32 = arith.constant 16 : i32
    %38 = tpu.dynamic_rotate %29 by %c16_i32 dim 1 : vector<8x256xf32>, i32 -> vector<8x256xf32>
    %39 = vector.broadcast %14 : vector<1x256xf32> to vector<8x256xf32>
    %40 = arith.addf %38, %39 : vector<8x256xf32>
    %c240_i32 = arith.constant 240 : i32
    %41 = tpu.dynamic_rotate %29 by %c240_i32 dim 1 : vector<8x256xf32>, i32 -> vector<8x256xf32>
    %42 = vector.broadcast %15 : vector<1x256xf32> to vector<8x256xf32>
    %43 = arith.addf %41, %42 : vector<8x256xf32>
    %44 = arith.maximumf %40, %43 : vector<8x256xf32>
    %45 = arith.maximumf %29, %44 : vector<8x256xf32>
    %c16_i32_10 = arith.constant 16 : i32
    %46 = tpu.dynamic_rotate %37 by %c16_i32_10 dim 1 : vector<8x256xf32>, i32 -> vector<8x256xf32>
    %47 = vector.broadcast %18 : vector<1x256xf32> to vector<8x256xf32>
    %48 = arith.mulf %46, %47 : vector<8x256xf32>
    %49 = arith.addf %37, %48 : vector<8x256xf32>
    %c240_i32_11 = arith.constant 240 : i32
    %50 = tpu.dynamic_rotate %37 by %c240_i32_11 dim 1 : vector<8x256xf32>, i32 -> vector<8x256xf32>
    %51 = vector.broadcast %19 : vector<1x256xf32> to vector<8x256xf32>
    %52 = arith.mulf %50, %51 : vector<8x256xf32>
    %53 = arith.addf %49, %52 : vector<8x256xf32>
    %54 = arith.addf %45, %9 : vector<8x256xf32>
    %c0_12 = arith.constant 0 : index
    %c0_13 = arith.constant 0 : index
    %55 = vector.load %arg7[%c0_12, %c0_13] : memref<16x256xf32, #tpu.memory_space<vmem>>, vector<8x256xf32>
    tpu.vector_store %arg7[%c0_12, %c0_13], %54 {strides = array<i32>} : memref<16x256xf32, #tpu.memory_space<vmem>>, vector<8x256xf32>,
    %c0_14 = arith.constant 0 : index
    %c0_15 = arith.constant 0 : index
    %56 = vector.load %arg6[%c0_14, %c0_15] : memref<1x256xf32, #tpu.memory_space<vmem>>, vector<1x256xf32>
    %57 = vector.broadcast %56 : vector<1x256xf32> to vector<8x256xf32>
    %58 = arith.mulf %53, %57 : vector<8x256xf32>
    %59 = arith.addf %58, %8 : vector<8x256xf32>
    %c8 = arith.constant 8 : index
    %c0_16 = arith.constant 0 : index
    %60 = vector.load %arg7[%c8, %c0_16] : memref<16x256xf32, #tpu.memory_space<vmem>>, vector<8x256xf32>
    tpu.vector_store %arg7[%c8, %c0_16], %59 {strides = array<i32>} : memref<16x256xf32, #tpu.memory_space<vmem>>, vector<8x256xf32>,
    return
  }
  func.func @transform_0(%arg0: i32) -> (i32, i32) {
    %c0_i32 = arith.constant 0 : i32
    %c0_i32_0 = arith.constant 0 : i32
    return %c0_i32, %arg0 : i32, i32
  }
  func.func @transform_1(%arg0: i32) -> (i32, i32) {
    %c0_i32 = arith.constant 0 : i32
    %c0_i32_0 = arith.constant 0 : i32
    %c0_i32_1 = arith.constant 0 : i32
    return %c0_i32, %c0_i32_0 : i32, i32
  }
  func.func @transform_2(%arg0: i32) -> (i32, i32) {
    %c0_i32 = arith.constant 0 : i32
    %c0_i32_0 = arith.constant 0 : i32
    %c0_i32_1 = arith.constant 0 : i32
    return %c0_i32, %c0_i32_0 : i32, i32
  }
  func.func @transform_3(%arg0: i32) -> (i32, i32) {
    %c0_i32 = arith.constant 0 : i32
    %c0_i32_0 = arith.constant 0 : i32
    %c0_i32_1 = arith.constant 0 : i32
    return %c0_i32, %c0_i32_0 : i32, i32
  }
  func.func @transform_4(%arg0: i32) -> (i32, i32) {
    %c0_i32 = arith.constant 0 : i32
    %c0_i32_0 = arith.constant 0 : i32
    %c0_i32_1 = arith.constant 0 : i32
    return %c0_i32, %c0_i32_0 : i32, i32
  }
  func.func @transform_5(%arg0: i32) -> (i32, i32) {
    %c0_i32 = arith.constant 0 : i32
    %c0_i32_0 = arith.constant 0 : i32
    %c0_i32_1 = arith.constant 0 : i32
    return %c0_i32, %c0_i32_0 : i32, i32
  }
  func.func @transform_6(%arg0: i32) -> (i32, i32) {
    %c0_i32 = arith.constant 0 : i32
    %c0_i32_0 = arith.constant 0 : i32
    return %c0_i32, %arg0 : i32, i32
  }
}

</mosaic_0001>

<bundles_post_ra>
// kernel: cell_forward.1
= control target key start
LH: loop header
LB: loop body
LE: loop exit
PB: predicated region body
PF: predicated region fallthrough
CT: control target
= control target key end

     0   :  { %s711_s21 = smov 0   ;;  %s713_s22 = smov 0   ;;  %s896_s0 = inlined_call_operand.vmem [shape: f32[16,512], index: 0, kind: input, shape index: {}]   ;;  %s897_s1 = inlined_call_operand.vmem [shape: f32[16,16], index: 1, kind: input, shape index: {}]   ;;  %s898_s2 = inlined_call_operand.vmem [shape: f32[16,1], index: 2, kind: input, shape index: {}]   ;;  %s899_s3 = inlined_call_operand.vmem [shape: f32[4,256], index: 3, kind: input, shape index: {}]   ;;  %s900_s4 = inlined_call_operand.vmem [shape: f32[4,256], index: 4, kind: input, shape index: {}]   ;;  %s901_s5 = inlined_call_operand.vmem [shape: f32[1,256], index: 5, kind: input, shape index: {}]   ;;  %s902_s6 = inlined_call_operand.vmem [shape: f32[16,512], index: 6, kind: output, shape index: {}]  }
   0x1   :  { %s715_s23 = smov 0  }
   0x2 LB: > { %s592_s24 = sadd.s32 4294967295, %s669_s23   ;;  %s728_s25 = sadd.s32 1, %s669_s23   ;;  %s669_s23 = sphi %s715_s23, %s906_s23   ;;  %s665_s22 = sphi %s713_s22, %s905_s22   ;;  %s661_s21 = sphi %s711_s21, %s904_s21  }
   0x3   : > { %s20_s26 = ssub.s32 %s669_s23, %s728_s25  ;;  %s23_s27 = sadd.s32 1, %s665_s22 }
   0x4   : > { %p21_p0 = scmp.eq.s32.totalorder %s20_s26, 0  ;;  %p30_p1 = scmp.ne.s32.totalorder %s665_s22, %s661_s21 }
   0x5   : > { %p31_p2 = scmp.eq.s32.totalorder %s669_s23, 0  ;;  %p165_p3 = scmp.eq.s32.totalorder %s592_s24, 1 }
   0x6   : > { %s739_s28 = scalar_select %p21_p0, %s665_s22, %s23_s27  }
   0x7   : > { %p32_p4 = por %p31_p2, %p30_p1  ;;  %p741_p5 = por %p165_p3, %p30_p1 }
   0x8   : > { %p595_p6 = scmp.ge.s32.totalorder %s669_s23, 2 }
   0xa   : > { %202 = sbr.rel (%p595_p6) target bundleno = 23 (0x17), region = 36 }
   0xf   : > { %205 = sbr.rel (!%p32_p4) target bundleno = 23 (0x17), region = 40  ;;  %s207_s30 = sand.u32 (%p32_p4), 1, %s665_s22  }
  0x10   : > { %s611_s7 = sshll.u32 (%p32_p4), %s669_s23, 4  ;;  %s596_s8 = sshll.u32 (%p32_p4), %s207_s30, 5 }
  0x11   : > { %s212_s11 = scalar_lea.vmem (%p32_p4), %s896_s0, %s611_s7  ;;  %s209_s12 = scalar_lea.vmem (%p32_p4), [#allocation2], %s596_s8 }
  0x12   : > { %v225_v0 = vld [vmem:[%s212_s11] sm:$0xff] (%p32_p4)  ;;  %v227_v1 = vld [vmem:[%s212_s11 + $0x8] sm:$0xff] (%p32_p4) }
  0x13   : > { %v229_v2 = vld [vmem:[%s212_s11 + $0x20] sm:$0xff] (%p32_p4)  ;;  %226 = vst [vmem:[%s209_s12] sm:$0xff] (%p32_p4), %v225_v0  ;;  %v231_v3 = vld [vmem:[%s212_s11 + $0x28] sm:$0xff] (%p32_p4) }
  0x14   : > { %228 = vst [vmem:[%s209_s12 + $0x8] sm:$0xff] %v227_v1 }
  0x15   : > { %230 = vst [vmem:[%s209_s12 + $0x10] sm:$0xff] %v229_v2 }
  0x16   : > { %232 = vst [vmem:[%s209_s12 + $0x18] sm:$0xff] %v231_v3 }
  0x17 PF: > { %p599_p7 = scmp.ge.s32.totalorder %s669_s23, 1  ;;  %p237_p8 = scmp.lt.s32.totalorder %s669_s23, 3 }
  0x19   : > { %p238_p9 = pnand %p599_p7, %p237_p8 }
  0x1a   : > { %s244_s13 = sand.u32 (!%p238_p9), 1, %s661_s21   ;;  %s672_s30 = smov (!%p238_p9), 127  }
  0x1b   : > { %241 = sbr.rel (%p238_p9) target bundleno = 451 (0x1c3), region = 63  ;;  %s757_s16 = sshll.u32 (!%p238_p9), %s244_s13, 5 }
  0x1c   : > { %s246_s17 = scalar_lea.vmem (!%p238_p9), [#allocation2], %s757_s16  ;;  %s673_s7 = smov (!%p238_p9), 1  }
  0x1d   : > { %s674_s10 = smov (!%p238_p9), 16   ;;  %s675_s11 = smov (!%p238_p9), 112  }
  0x1e   : > { %s852_s14 = scalar_lea.vmem (!%p238_p9), [#allocation3], %s757_s16 }
  0x20   : > { %v285_v4 = vld [vmem:[%s898_s2 + $0x8] sm:$0xff]  ;;  %v671_v5 = vmov 0   ;;  %v278_v6 = vld [vmem:[%s246_s17 + $0x10] sm:$0xff]  ;;  %v279_v7 = vld [vmem:[%s246_s17 + $0x18] sm:$0xff]  ;;  %vm296_vm0 = vcmask 130048   ;;  %v359_v28 = vlaneseq }
  0x21   : > { %646 = vset.pattern.permute.xlu0 %v671_v5  ;;  %v276_v8 = vld [vmem:[%s246_s17] sm:$0xff]  ;;  %v282_v9 = vmax.f32 %v278_v6, 0.0  ;;  %v283_v10 = vmax.f32 %v279_v7, 0.0  ;;  %v277_v12 = vld [vmem:[%s246_s17 + $0x8] sm:$0xff]  ;;  %s612_s17 = sshll.u32 (%p741_p5), %s592_s24, 4 }
  0x22   : > { %293 = vperm.xlu0 %646, %v285_v4   ;;  %v280_v11 = vmax.f32 %v276_v8, 0.0  ;;  %v281_v13 = vmax.f32 %v277_v12, 0.0  ;;  %v274_v14 = vld [vmem:[%s897_s1] sm:$0xff]  ;;  %v275_v15 = vld [vmem:[%s897_s1 + $0x8] sm:$0xff]  ;;  %v790_v31 = vand.u32 127, %v359_v28  ;;  %s512_s20 = scalar_lea.vmem (%p741_p5), %s902_s6, %s612_s17 }
  0x23   : > { %317 = vmatpush.msra.mxu0 %v282_v9  ;;  %613 = vmatpush.msra.mxu2 %v282_v9  ;;  %v284_v16 = vld [vmem:[%s898_s2] sm:$0xff] }
  0x24   : > { %615 = vmatpush.msra.mxu3 %v283_v10  ;;  %340 = vmatpush.msra.mxu1 %v283_v10  ;;  %v788_v29 = vld [vmem:[%s899_s3] sm:$0xff]  ;;  %vm361_vm1 = vcmp.lt.s32.totalorder %v790_v31, 1  ;;  %vm374_vm2 = vcmp.lt.s32.totalorder %v790_v31, 127  ;;  %vm425_vm3 = vcmp.lt.s32.totalorder %v790_v31, 16  ;;  %vm440_vm4 = vcmp.lt.s32.totalorder %v790_v31, 112 }
  0x25   : > { %318 = vmatpush.msra.mxu0 %v280_v11  ;;  %614 = vmatpush.msra.mxu2 %v280_v11  ;;  %v380_v32 = vperm.slane %v788_v29, 0  ;;  %v381_v33 = vperm.slane %v788_v29, 4  ;;  %v388_v34 = vperm.slane %v788_v29, 1  ;;  %v389_v35 = vperm.slane %v788_v29, 5  ;;  %v814_v55 = vld [vmem:[%s900_s4] sm:$0xff] }
  0x26   : > { %616 = vmatpush.msra.mxu3 %v281_v13  ;;  %602 = vmatmul.msk.f32.vlgmr.msra.gmra.mxu0 %vm296_vm0, %v274_v14  ;;  %v401_v56 = vperm.slane %v814_v55, 0  ;;  %v402_v57 = vperm.slane %v814_v55, 4  ;;  %v411_v61 = vperm.slane %v814_v55, 1  ;;  %v412_v62 = vperm.slane %v814_v55, 5 }
  0x27   : > { %603 = vmatmul.msk.f32.vlgmr.msra.gmra.mxu2 %vm296_vm0, %v275_v15  ;;  %605 = vmatmul.msk.f32.vlgmr.msra.gmra.mxu3 %vm296_vm0, %v275_v15  ;;  %v384_v36 = vperm.slane %v380_v32, 0  ;;  %v385_v37 = vperm.slane %v381_v33, 0  ;;  %v392_v38 = vperm.slane %v388_v34, 1  ;;  %v393_v39 = vperm.slane %v389_v35, 1 }
  0x28   : > { %341 = vmatpush.msra.mxu1 %v281_v13  ;;  %v405_v59 = vperm.slane %v401_v56, 0  ;;  %v406_v60 = vperm.slane %v402_v57, 0  ;;  %v415_v3 = vperm.slane %v411_v61, 1  ;;  %v416_v4 = vperm.slane %v412_v62, 1 }
  0x29   : > { %604 = vmatmul.msk.f32.vlgmr.msra.gmra.mxu1 %vm296_vm0, %v274_v14 }
  0x2a   : > { %288 = vperm.xlu0 %646, %v284_v16   ;;  %v428_v16 = vperm.slane %v788_v29, 2 }
  0x94   : > { %v294_v17 = vpop.permute.xlu0 %293 }
  0x9c   : > { %v289_v18 = vpop.permute.xlu0 %288 }
  0xa3   : > { %v320_v19 = vpop.f32.mrf.mxu0 }
  0xa4   : > { %v769_v20 = vadd.f32 %v320_v19, %v289_v18  ;;  %v444_v19 = vperm.slane %v788_v29, 7 }
  0xa6   : > { %366 = vrot.lane.b32.xlu0 %v769_v20, %s672_s30  ;;  %351 = vrot.lane.b32.xlu2 %v769_v20, %s673_s7  ;;  %v343_v21 = vpop.f32.mrf.mxu1  ;;  %v448_v28 = vperm.slane %v444_v19, 3 }
  0xa7   : > { %v775_v25 = vadd.f32 %v343_v21, %v289_v18  ;;  %v443_v18 = vperm.slane %v788_v29, 3 }
  0xaa   : > { %v323_v22 = vpop.f32.mrf.mxu2  ;;  %v346_v23 = vpop.f32.mrf.mxu3 }
  0xab   : > { %v773_v24 = vadd.f32 %v323_v22, %v294_v17  ;;  %v777_v26 = vadd.f32 %v346_v23, %v294_v17  ;;  %v429_v17 = vperm.slane %v788_v29, 6  ;;  %v432_v22 = vperm.slane %v428_v16, 2 }
  0xad   : > { %353 = vrot.lane.b32.xlu1 %v773_v24, %s673_s7  ;;  %v433_v23 = vperm.slane %v429_v17, 2 }
  0xae   : > { %372 = vrot.lane.b32.xlu0 %v777_v26, %s672_s30  ;;  %355 = vrot.lane.b32.xlu2 %v775_v25, %s673_s7 }
  0xb5   : > { %357 = vrot.lane.b32.xlu1 %v777_v26, %s673_s7 }
  0xb6   : > { %370 = vrot.lane.b32.xlu2 %v775_v25, %s672_s30 }
  0xbd   : > { %368 = vrot.lane.b32.xlu1 %v773_v24, %s672_s30 }
 0x100   : > { %v352_v27 = vpop.permute.xlu2 %351 }
 0x108   : > { %v356_v30 = vpop.permute.xlu2 %355 }
 0x109   : > { %v362_v40 = vsel %vm361_vm1, %v352_v27, %v356_v30  ;;  %v364_v41 = vsel %vm361_vm1, %v356_v30, %v352_v27  ;;  %v447_v27 = vperm.slane %v443_v18, 3 }
 0x10a   : > { %v386_v46 = vadd.f32 %v384_v36, %v364_v41  ;;  %v387_v47 = vadd.f32 %v385_v37, %v362_v40 }
 0x110   : > { %v371_v42 = vpop.permute.xlu2 %370 }
 0x118   : > { %v367_v43 = vpop.permute.xlu0 %366 }
 0x119   : > { %v375_v44 = vsel %vm374_vm2, %v367_v43, %v371_v42  ;;  %v377_v45 = vsel %vm374_vm2, %v371_v42, %v367_v43 }
 0x11a   : > { %v394_v48 = vadd.f32 %v392_v38, %v375_v44  ;;  %v395_v49 = vadd.f32 %v393_v39, %v377_v45 }
 0x11c   : > { %v396_v50 = vmax.f32 %v386_v46, %v394_v48  ;;  %v397_v51 = vmax.f32 %v387_v47, %v395_v49  ;;  %v461_v47 = vperm.slane %v814_v55, 2  ;;  %v462_v48 = vperm.slane %v814_v55, 6 }
 0x11e   : > { %v399_v52 = vmax.f32 %v775_v25, %v397_v51  ;;  %v398_v53 = vmax.f32 %v769_v20, %v396_v50  ;;  %v465_v50 = vperm.slane %v461_v47, 2  ;;  %v466_v51 = vperm.slane %v462_v48, 2 }
 0x11f   : > { %v354_v54 = vpop.permute.xlu1 %353 }
 0x120   : > { %423 = vrot.lane.b32.xlu1 %v399_v52, %s674_s10  ;;  %436 = vrot.lane.b32.xlu2 %v398_v53, %s675_s11  ;;  %v373_v5 = vpop.permute.xlu0 %372 }
 0x121   : > { %421 = vrot.lane.b32.xlu0 %v398_v53, %s674_s10 }
 0x127   : > { %v358_v58 = vpop.permute.xlu1 %357 }
 0x128   : > { %v363_v63 = vsel %vm361_vm1, %v354_v54, %v358_v58  ;;  %v365_v0 = vsel %vm361_vm1, %v358_v58, %v354_v54 }
 0x129   : > { %438 = vrot.lane.b32.xlu0 %v399_v52, %s675_s11  ;;  %v407_v1 = vmul.f32 %v405_v59, %v365_v0  ;;  %v408_v2 = vmul.f32 %v406_v60, %v363_v63  ;;  %v491_v59 = vld [vmem:[%s901_s5] sm:$0x3] }
 0x12a   : > { %v493_v62 = vperm.slane %v491_v59, 0 }
 0x12b   : > { %v409_v9 = vadd.f32 %v407_v1, %v773_v24  ;;  %v410_v10 = vadd.f32 %v408_v2, %v777_v26 }
 0x12f   : > { %v369_v6 = vpop.permute.xlu1 %368 }
 0x130   : > { %v376_v7 = vsel %vm374_vm2, %v369_v6, %v373_v5  ;;  %v378_v8 = vsel %vm374_vm2, %v373_v5, %v369_v6 }
 0x131   : > { %v417_v11 = vmul.f32 %v415_v3, %v376_v7  ;;  %v418_v12 = vmul.f32 %v416_v4, %v378_v8 }
 0x133   : > { %v419_v13 = vadd.f32 %v417_v11, %v409_v9  ;;  %v420_v14 = vadd.f32 %v418_v12, %v410_v10 }
 0x135   : > { %455 = vrot.lane.b32.xlu1 %v419_v13, %s674_s10  ;;  %457 = vrot.lane.b32.xlu2 %v420_v14, %s674_s10 }
 0x13d   : > { %471 = vrot.lane.b32.xlu1 %v419_v13, %s675_s11  ;;  %473 = vrot.lane.b32.xlu2 %v420_v14, %s675_s11 }
 0x17a   : > { %v437_v33 = vpop.permute.xlu2 %436 }
 0x18f   : > { %v458_v46 = vpop.permute.xlu2 %457 }
 0x192   : > { %v424_v21 = vpop.permute.xlu1 %423 }
 0x193   : > { %v422_v15 = vpop.permute.xlu0 %421 }
 0x194   : > { %v426_v30 = vsel %vm425_vm3, %v422_v15, %v424_v21  ;;  %v427_v32 = vsel %vm425_vm3, %v424_v21, %v422_v15 }
 0x195   : > { %v434_v36 = vadd.f32 %v432_v22, %v427_v32  ;;  %v435_v37 = vadd.f32 %v433_v23, %v426_v30 }
 0x197   : > { %v474_v60 = vpop.permute.xlu2 %473 }
 0x19b   : > { %v439_v34 = vpop.permute.xlu0 %438 }
 0x19c   : > { %v441_v29 = vsel %vm440_vm4, %v437_v33, %v439_v34  ;;  %v442_v35 = vsel %vm440_vm4, %v439_v34, %v437_v33 }
 0x19d   : > { %v449_v38 = vadd.f32 %v447_v27, %v441_v29  ;;  %v450_v39 = vadd.f32 %v448_v28, %v442_v35 }
 0x19f   : > { %v451_v40 = vmax.f32 %v434_v36, %v449_v38  ;;  %v452_v41 = vmax.f32 %v435_v37, %v450_v39 }
 0x1a1   : > { %v453_v42 = vmax.f32 %v398_v53, %v451_v40  ;;  %v454_v43 = vmax.f32 %v399_v52, %v452_v41  ;;  %v477_v52 = vperm.slane %v814_v55, 3 }
 0x1a3   : > { %v487_v44 = vadd.f32 %v453_v42, %v773_v24  ;;  %v488_v45 = vadd.f32 %v454_v43, %v777_v26  ;;  %v478_v24 = vperm.slane %v814_v55, 7  ;;  %v481_v57 = vperm.slane %v477_v52, 3 }
 0x1a4   : > { %v494_v55 = vperm.slane %v491_v59, 1 }
 0x1a5   : > { %489 = vst [vmem:[%s852_s14] sm:$0xff] %v487_v44  ;;  %v482_v58 = vperm.slane %v478_v24, 3 }
 0x1a6   : > { %490 = vst [vmem:[%s852_s14 + $0x8] sm:$0xff] %v488_v45 }
 0x1a7   : > { %v456_v49 = vpop.permute.xlu1 %455 }
 0x1a8   : > { %v459_v26 = vsel %vm425_vm3, %v456_v49, %v458_v46  ;;  %v460_v53 = vsel %vm425_vm3, %v458_v46, %v456_v49 }
 0x1a9   : > { %v467_v54 = vmul.f32 %v465_v50, %v460_v53  ;;  %v468_v56 = vmul.f32 %v466_v51, %v459_v26 }
 0x1ab   : > { %v469_v1 = vadd.f32 %v467_v54, %v419_v13  ;;  %v470_v2 = vadd.f32 %v468_v56, %v420_v14 }
 0x1ac   : > { %v525_v31 = vld [vmem:[%s852_s14] sm:$0xff] (%p741_p5) }
 0x1ad   : > { %v527_v11 = vld [vmem:[%s852_s14 + $0x8] sm:$0xff] (%p741_p5)  ;;  %526 = vst [vmem:[%s512_s20] sm:$0xff] (%p741_p5), %v525_v31 }
 0x1ae   : > { %528 = vst [vmem:[%s512_s20 + $0x8] sm:$0xff] (%p741_p5), %v527_v11 }
 0x1af   : > { %v472_v61 = vpop.permute.xlu1 %471 }
 0x1b0   : > { %v475_v63 = vsel %vm440_vm4, %v472_v61, %v474_v60  ;;  %v476_v0 = vsel %vm440_vm4, %v474_v60, %v472_v61 }
 0x1b1   : > { %v483_v3 = vmul.f32 %v481_v57, %v475_v63  ;;  %v484_v4 = vmul.f32 %v482_v58, %v476_v0 }
 0x1b3   : > { %v485_v5 = vadd.f32 %v483_v3, %v469_v1  ;;  %v486_v6 = vadd.f32 %v484_v4, %v470_v2 }
 0x1b5   : > { %v497_v7 = vmul.f32 %v493_v62, %v485_v5  ;;  %v498_v8 = vmul.f32 %v494_v55, %v486_v6 }
 0x1b6   : > { %509 = sbr.rel (!%p741_p5) target bundleno = 451 (0x1c3), region = 71 }
 0x1b7   : > { %v499_v9 = vadd.f32 %v497_v7, %v769_v20  ;;  %v500_v10 = vadd.f32 %v498_v8, %v775_v25 }
 0x1b9   : > { %501 = vst [vmem:[%s852_s14 + $0x10] sm:$0xff] %v499_v9 }
 0x1ba   : > { %502 = vst [vmem:[%s852_s14 + $0x18] sm:$0xff] %v500_v10 }
 0x1c0   : > { %v529_v20 = vld [vmem:[%s852_s14 + $0x10] sm:$0xff] }
 0x1c1   : > { %v531_v25 = vld [vmem:[%s852_s14 + $0x18] sm:$0xff]  ;;  %530 = vst [vmem:[%s512_s20 + $0x20] sm:$0xff] %v529_v20 }
 0x1c2   : > { %532 = vst [vmem:[%s512_s20 + $0x28] sm:$0xff] %v531_v25 }
 0x1c3 PF: > { %p13_p10 = scmp.ge.s32.totalorder %s728_s25, 4   ;;  %s904_s21 = smov %s665_s22 }
 0x1c4   : > { %s905_s22 = smov %s739_s28  ;;  %s906_s23 = smov %s728_s25 }
 0x1c5   :  { %15 = sbr.rel (!%p13_p10) target bundleno = 2 (0x2), region = 125 }

</bundles_post_ra>
